<compile_context>
chip_gen: v6e
topology: v6e:2x2x1
jax: 0.10.0
libtpu: 0.0.40
codegen_flags: <defaults>
</compile_context>

<pallas_src>
import jax
import jax.numpy as jnp
from jax.experimental import pallas as pl
from jax.experimental.pallas import tpu as pltpu

LEAKY_SLOPE = 0.01
BN_EPS = 1e-5
LANE = 128          # lane-dense padded output width
D_HID = 256         # domain-discriminator hidden width


def _leaky_relu(x):
    return jnp.where(x >= 0, x, LEAKY_SLOPE * x)


# ---------------------------------------------------------------------------
# Kernel
#   grid = (batch_tiles i, spatial_tiles j)   (j is the fast/inner axis)
#   x_ref    : (TILE_N, C, HW_TILE) f32        streamed
#   wp_ref   : (C, 512)      bf16   (pre-transposed, 1/HW folded in)
#   w1_ref   : (512, WIDTH)  bf16   (pre-transposed)
#   wcd_ref  : (WIDTH, 384)  bf16   (cols 0..255 = wd1^T, 256.. = wc^T, 0-pad)
#   wd2_ref  : (256, 128)    bf16   (cols 0..1 = wd2^T, 0-pad)
#   bias_ref : (1, 512+WIDTH+384+128) f32  [bp | b1 | bcd | bd2]
#   out_ref  : (N, 256) f32  (lanes 0..127 classifier slab, 128..255 domain slab)
#   pooled_acc : VMEM (TILE_N, C) f32   spatial-sum accumulator
#   h_scratch  : VMEM (N, WIDTH) f32    whole-batch pre-BN activations
# ---------------------------------------------------------------------------
def grl_net_kernel(x_ref, wp_ref, w1_ref, wcd_ref, wd2_ref, bias_ref,
                   out_ref, pooled_acc, h_scratch):
    i = pl.program_id(0)
    j = pl.program_id(1)
    last_i = pl.num_programs(0) - 1
    last_j = pl.num_programs(1) - 1

    feat = wp_ref.shape[1]
    width = w1_ref.shape[1]
    ncd = wcd_ref.shape[1]            # 256 + 128
    tile_n = pooled_acc.shape[0]

    # ---- phase 1: stream spatial tiles of x, accumulate the pooling sum -----
    @pl.when(j == 0)
    def _():
        pooled_acc[...] = jnp.zeros_like(pooled_acc)

    pooled_acc[...] += jnp.sum(x_ref[...], axis=-1)          # (TILE_N, C) f32

    # ---- phase 2: once per batch tile -> backbone proj + fc Linear ----------
    @pl.when(j == last_j)
    def _():
        bp = bias_ref[:, :feat]
        b1 = bias_ref[:, feat:feat + width]
        feat_v = jnp.dot(pooled_acc[...].astype(jnp.bfloat16), wp_ref[...],
                         preferred_element_type=jnp.float32) + bp
        h = jnp.dot(feat_v.astype(jnp.bfloat16), w1_ref[...],
                    preferred_element_type=jnp.float32) + b1
        # park this batch tile in the whole-batch scratch (stays in VMEM)
        h_scratch[pl.ds(i * tile_n, tile_n), :] = h

    # ---- phase 3: once, after all batch tiles -> BatchNorm + both heads -----
    @pl.when((j == last_j) & (i == last_i))
    def _():
        hall = h_scratch[...]                                 # (N, WIDTH) f32
        mu = jnp.mean(hall, axis=0, keepdims=True)
        hc = hall - mu
        var = jnp.mean(hc * hc, axis=0, keepdims=True)        # biased var
        tmp = _leaky_relu(hc * jax.lax.rsqrt(var + BN_EPS))

        # fused [domain layer-1 | classifier(padded to 128 lanes)] matmul
        bcd = bias_ref[:, feat + width:feat + width + ncd]
        z = jnp.dot(tmp.astype(jnp.bfloat16), wcd_ref[...],
                    preferred_element_type=jnp.float32) + bcd  # (N, 384)
        d1 = _leaky_relu(z[:, :D_HID])
        out_ref[:, :LANE] = z[:, D_HID:D_HID + LANE]           # classifier slab

        # domain discriminator layer-2 (256 -> 2, padded to 128 lanes)
        bd2 = bias_ref[:, feat + width + ncd:feat + width + ncd + LANE]
        out_ref[:, LANE:] = jnp.dot(d1.astype(jnp.bfloat16), wd2_ref[...],
                                    preferred_element_type=jnp.float32) + bd2


# ---------------------------------------------------------------------------
# Tiling heuristics
# ---------------------------------------------------------------------------
def _pick_tiles(n, c, hw, x_tile_budget_bytes):
    # batch tile: largest power-of-two divisor of n, capped at 128
    tile_n = 1
    for cand in (128, 64, 32, 16, 8, 4, 2, 1):
        if cand <= n and n % cand == 0:
            tile_n = cand
            break
    # spatial tile: multiple of 128 dividing hw (or full hw) so that the
    # double-buffered f32 x tile stays inside the budget
    if hw % 128 == 0:
        per_elem = 2 * tile_n * c * 4
        hw_tile = max(128, (x_tile_budget_bytes // per_elem) // 128 * 128)
        hw_tile = min(hw, hw_tile)
        while hw % hw_tile != 0:
            hw_tile -= 128
    else:
        hw_tile = hw
    return tile_n, hw_tile


# ---------------------------------------------------------------------------
# Wrapper
# ---------------------------------------------------------------------------
def grl_net_forward(x_nchw, kp, num_class, *, tile_n=None,
                    x_tile_budget_bytes=8 << 20):
    n, c, h, w = x_nchw.shape
    hw = h * w
    x_flat = x_nchw.reshape(n, c, hw)                 # glue reshape NCHW -> N,C,HW

    feat, width = kp["w1"].shape

    auto_tn, hw_tile = _pick_tiles(n, c, hw, x_tile_budget_bytes)
    tn = tile_n if tile_n is not None else auto_tn
    # TODO(synk): ragged batch needs padding + masked BN statistics.
    assert n % tn == 0, "batch must be divisible by the batch tile"
    assert hw % hw_tile == 0
    grid = (n // tn, hw // hw_tile)

    const2 = lambda i, j: (0, 0)
    in_specs = [
        pl.BlockSpec((tn, c, hw_tile), lambda i, j: (i, 0, j)),  # x (streamed)
        pl.BlockSpec(kp["wp"].shape, const2),                    # resident weights
        pl.BlockSpec(kp["w1"].shape, const2),
        pl.BlockSpec(kp["wcd"].shape, const2),
        pl.BlockSpec(kp["wd2"].shape, const2),
        pl.BlockSpec(kp["bias"].shape, const2),
    ]
    out_specs = pl.BlockSpec((n, 2 * LANE), const2)

    # rough cost hint for XLA scheduling around this call
    flops = int(2 * n * (c * feat + feat * width + width * (D_HID + LANE)
                         + D_HID * LANE) + n * c * hw)
    weight_bytes = sum(int(v.nbytes) for v in kp.values())
    bytes_accessed = int(x_flat.nbytes) + weight_bytes + n * 2 * LANE * 4

    # explicit VMEM budget (v7x: 64 MiB physical -> cap at 48 MiB; also lifts
    # v5e's 16 MiB default scoped limit)
    vmem_need = (2 * tn * c * hw_tile * 4 + 2 * weight_bytes
                 + (tn * c + n * width + n * 2 * LANE) * 4)
    vmem_limit = int(min(max(vmem_need * 3 // 2 + (1 << 20), 4 << 20), 48 << 20))

    out = pl.pallas_call(
        grl_net_kernel,
        out_shape=jax.ShapeDtypeStruct((n, 2 * LANE), jnp.float32),
        grid_spec=pltpu.PrefetchScalarGridSpec(
            num_scalar_prefetch=0,
            grid=grid,
            in_specs=in_specs,
            out_specs=out_specs,
            scratch_shapes=[
                pltpu.VMEM((tn, c), jnp.float32),       # pooled-sum accumulator
                pltpu.VMEM((n, width), jnp.float32),    # whole-batch h (for BN)
            ],
        ),
        compiler_params=pltpu.CompilerParams(
            # both axes are reduction-coupled (pool accumulation / BN stats)
            dimension_semantics=("arbitrary", "arbitrary"),
            vmem_limit_bytes=vmem_limit,
        ),
        cost_estimate=pl.CostEstimate(
            flops=flops, transcendentals=width, bytes_accessed=bytes_accessed),
    )(x_flat, kp["wp"], kp["w1"], kp["wcd"], kp["wd2"], kp["bias"])

    return out[:, :num_class], out[:, LANE:LANE + 2]


# ---------------------------------------------------------------------------
# Parameter construction (mirrors GRL_Net.__init__ inits) + kernel packing
# ---------------------------------------------------------------------------
def make_raw_params(key, in_channels, feat_dim, width, num_class):
    ks = jax.random.split(key, 5)
    return {
        # backbone substitute projection (synthetic, see TODO at top)
        "wp": 0.01 * jax.random.normal(ks[0], (feat_dim, in_channels), jnp.float32),
        "bp": jnp.zeros((feat_dim,), jnp.float32),
        # fc_layers[0]: weight ~ N(0, 0.005), bias = 0.1
        "w1": 0.005 * jax.random.normal(ks[1], (width, feat_dim), jnp.float32),
        "b1": jnp.full((width,), 0.1, jnp.float32),
        # classifier_layer[0]: weight ~ N(0, 0.01), bias = 0.0
        "wc": 0.01 * jax.random.normal(ks[2], (num_class, width), jnp.float32),
        "bc": jnp.zeros((num_class,), jnp.float32),
        # domain_discriminator[1]: Linear(width, 256)
        "wd1": 0.01 * jax.random.normal(ks[3], (D_HID, width), jnp.float32),
        "bd1": jnp.zeros((D_HID,), jnp.float32),
        # domain_discriminator[3]: Linear(256, 2)
        "wd2": 0.01 * jax.random.normal(ks[4], (2, D_HID), jnp.float32),
        "bd2": jnp.zeros((2,), jnp.float32),
    }


def pack_params(raw, hw, num_class):
    """Pre-transpose, fuse, zero-pad, bf16-cast weights; merge biases."""
    assert num_class <= LANE
    width, feat = raw["w1"].shape

    # backbone projection: pre-transpose + fold 1/HW of the average pool in
    wp_t = (raw["wp"].T / float(hw)).astype(jnp.bfloat16)            # (C, FEAT)
    w1_t = raw["w1"].T.astype(jnp.bfloat16)                          # (FEAT, W)

    # fuse domain layer-1 (W->256) with classifier (W->num_class, pad to 128)
    wcd = jnp.zeros((width, D_HID + LANE), jnp.float32)
    wcd = wcd.at[:, :D_HID].set(raw["wd1"].T)
    wcd = wcd.at[:, D_HID:D_HID + num_class].set(raw["wc"].T)

    # domain layer-2 (256 -> 2), zero-padded to 128 output lanes
    wd2 = jnp.zeros((D_HID, LANE), jnp.float32).at[:, :2].set(raw["wd2"].T)

    # merged bias slab: [bp | b1 | bcd | bd2]  (all offsets multiples of 128)
    ncd = D_HID + LANE
    bias = jnp.zeros((1, feat + width + ncd + LANE), jnp.float32)
    bias = bias.at[0, :feat].set(raw["bp"])
    bias = bias.at[0, feat:feat + width].set(raw["b1"])
    bias = bias.at[0, feat + width:feat + width + D_HID].set(raw["bd1"])
    bias = bias.at[0, feat + width + D_HID:feat + width + D_HID + num_class].set(raw["bc"])
    off = feat + width + ncd
    bias = bias.at[0, off:off + 2].set(raw["bd2"])

    return {"wp": wp_t, "w1": w1_t,
            "wcd": wcd.astype(jnp.bfloat16), "wd2": wd2.astype(jnp.bfloat16),
            "bias": bias}


if __name__ == "__main__":
    key = jax.random.PRNGKey(0)
    k_x, k_p = jax.random.split(key)

    # small shapes: batch=2, channels=4, spatial=16x16
    N, C, H, W = 2, 4, 16, 16
    FEAT_DIM = 512        # resnet18.output_num()
    WIDTH = 256           # module default is 1024; 256 keeps the demo small and
                          # is aligned to the 256-wide MXU on v6e/v7x
    NUM_CLASS = 8

    x = jax.random.normal(k_x, (N, C, H, W), jnp.float32)   # NCHW like PyTorch
    raw = make_raw_params(k_p, C, FEAT_DIM, WIDTH, NUM_CLASS)
    kp = pack_params(raw, H * W, NUM_CLASS)

    # tiny tiles so the toy demo also exercises the multi-step (batch, spatial)
    # grid path (2 batch tiles x 2 spatial tiles)
    clf, domain = grl_net_forward(x, kp, NUM_CLASS, tile_n=1,
                                  x_tile_budget_bytes=4096)
    jax.block_until_ready((clf, domain))

    assert clf.shape == (N, NUM_CLASS)
    assert domain.shape == (N, 2)
    print("KERNEL_OK")
</pallas_src>

<mosaic_0001>
module attributes {stable_mosaic.version = 11 : i64} {
  func.func @grl_net_kernel(%arg0: i32, %arg1: i32, %arg2: memref<1x4x128xf32, #tpu.memory_space<vmem>>, %arg3: memref<4x512xbf16, #tpu.memory_space<vmem>>, %arg4: memref<512x256xbf16, #tpu.memory_space<vmem>>, %arg5: memref<256x384xbf16, #tpu.memory_space<vmem>>, %arg6: memref<256x128xbf16, #tpu.memory_space<vmem>>, %arg7: memref<1x1280xf32, #tpu.memory_space<vmem>>, %arg8: memref<2x256xf32, #tpu.memory_space<vmem>>, %arg9: memref<1x4xf32, #tpu.memory_space<vmem>>, %arg10: memref<2x256xf32, #tpu.memory_space<vmem>>) attributes {dimension_semantics = [#tpu.dimension_semantics<arbitrary>, #tpu.dimension_semantics<arbitrary>], iteration_bounds = array<i64: 2, 2>, scalar_prefetch = 0 : i64, scratch_operands = 2 : i64, tpu.core_type = #tpu.core_type<tc>, window_params = [{transform_indices = @transform_0, window_bounds = array<i64: 1, 4, 128>}, {pipeline_mode = #tpu.pipeline_mode<synchronous>, transform_indices = @transform_1, window_bounds = array<i64: 4, 512>}, {pipeline_mode = #tpu.pipeline_mode<synchronous>, transform_indices = @transform_2, window_bounds = array<i64: 512, 256>}, {pipeline_mode = #tpu.pipeline_mode<synchronous>, transform_indices = @transform_3, window_bounds = array<i64: 256, 384>}, {pipeline_mode = #tpu.pipeline_mode<synchronous>, transform_indices = @transform_4, window_bounds = array<i64: 256, 128>}, {pipeline_mode = #tpu.pipeline_mode<synchronous>, transform_indices = @transform_5, window_bounds = array<i64: 1, 1280>}, {pipeline_mode = #tpu.pipeline_mode<synchronous>, transform_indices = @transform_6, window_bounds = array<i64: 2, 256>}]} {
    %c0_i32 = arith.constant 0 : i32
    %0 = arith.cmpi eq, %arg1, %c0_i32 : i32
    %1 = arith.extui %0 : i1 to i32
    %c0_i32_0 = arith.constant 0 : i32
    %2 = arith.cmpi ne, %1, %c0_i32_0 : i32
    scf.if %2 {
      %cst_11 = arith.constant 0.000000e+00 : f32
      %16 = vector.broadcast %cst_11 : f32 to vector<1x4xf32>
      %c0_12 = arith.constant 0 : index
      %c0_13 = arith.constant 0 : index
      %17 = vector.load %arg9[%c0_12, %c0_13] : memref<1x4xf32, #tpu.memory_space<vmem>>, vector<1x4xf32>
      tpu.vector_store %arg9[%c0_12, %c0_13], %16 {strides = array<i32>} : memref<1x4xf32, #tpu.memory_space<vmem>>, vector<1x4xf32>,
    } else {
    }
    %c0 = arith.constant 0 : index
    %c0_1 = arith.constant 0 : index
    %3 = vector.load %arg9[%c0, %c0_1] : memref<1x4xf32, #tpu.memory_space<vmem>>, vector<1x4xf32>
    %c0_2 = arith.constant 0 : index
    %c0_3 = arith.constant 0 : index
    %c0_4 = arith.constant 0 : index
    %4 = vector.load %arg2[%c0_2, %c0_3, %c0_4] : memref<1x4x128xf32, #tpu.memory_space<vmem>>, vector<1x4x128xf32>
    %cst = arith.constant dense<0.000000e+00> : vector<1x4xf32>
    %5 = vector.multi_reduction <add>, %4, %cst [2] : vector<1x4x128xf32> to vector<1x4xf32>
    %6 = arith.addf %3, %5 : vector<1x4xf32>
    %c0_5 = arith.constant 0 : index
    %c0_6 = arith.constant 0 : index
    %7 = vector.load %arg9[%c0_5, %c0_6] : memref<1x4xf32, #tpu.memory_space<vmem>>, vector<1x4xf32>
    tpu.vector_store %arg9[%c0_5, %c0_6], %6 {strides = array<i32>} : memref<1x4xf32, #tpu.memory_space<vmem>>, vector<1x4xf32>,
    %c1_i32 = arith.constant 1 : i32
    %8 = arith.cmpi eq, %arg1, %c1_i32 : i32
    %9 = arith.extui %8 : i1 to i32
    %c0_i32_7 = arith.constant 0 : i32
    %10 = arith.cmpi ne, %9, %c0_i32_7 : i32
    scf.if %10 {
      %c0_11 = arith.constant 0 : index
      %c0_12 = arith.constant 0 : index
      %16 = vector.load %arg7[%c0_11, %c0_12] : memref<1x1280xf32, #tpu.memory_space<vmem>>, vector<1x512xf32>
      %c0_13 = arith.constant 0 : index
      %c512 = arith.constant 512 : index
      %17 = vector.load %arg7[%c0_13, %c512] : memref<1x1280xf32, #tpu.memory_space<vmem>>, vector<1x256xf32>
      %c0_14 = arith.constant 0 : index
      %c0_15 = arith.constant 0 : index
      %18 = vector.load %arg9[%c0_14, %c0_15] : memref<1x4xf32, #tpu.memory_space<vmem>>, vector<1x4xf32>
      %19 = arith.truncf %18 : vector<1x4xf32> to vector<1x4xbf16>
      %c0_16 = arith.constant 0 : index
      %c0_17 = arith.constant 0 : index
      %20 = vector.load %arg3[%c0_16, %c0_17] : memref<4x512xbf16, #tpu.memory_space<vmem>>, vector<4x512xbf16>
      %cst_18 = arith.constant dense<0.000000e+00> : vector<1x512xf32>
      %21 = tpu.matmul %19, %20, %cst_18 {dimension_numbers = #tpu.dot_dimension_numbers<[1], [0], [0], [1], [0, 0, 1, 1], [], []>} : vector<1x4xbf16>, vector<4x512xbf16>, vector<1x512xf32> -> vector<1x512xf32>
      %22 = arith.addf %21, %16 : vector<1x512xf32>
      %23 = arith.truncf %22 : vector<1x512xf32> to vector<1x512xbf16>
      %c0_19 = arith.constant 0 : index
      %c0_20 = arith.constant 0 : index
      %24 = vector.load %arg4[%c0_19, %c0_20] : memref<512x256xbf16, #tpu.memory_space<vmem>>, vector<512x256xbf16>
      %cst_21 = arith.constant dense<0.000000e+00> : vector<1x256xf32>
      %25 = tpu.matmul %23, %24, %cst_21 {dimension_numbers = #tpu.dot_dimension_numbers<[1], [0], [0], [1], [0, 0, 1, 1], [], []>} : vector<1x512xbf16>, vector<512x256xbf16>, vector<1x256xf32> -> vector<1x256xf32>
      %26 = arith.addf %25, %17 : vector<1x256xf32>
      %c1_i32_22 = arith.constant 1 : i32
      %27 = arith.muli %arg0, %c1_i32_22 : i32
      %28 = arith.index_cast %27 : i32 to index
      %c0_23 = arith.constant 0 : index
      %29 = vector.load %arg10[%28, %c0_23] : memref<2x256xf32, #tpu.memory_space<vmem>>, vector<1x256xf32>
      tpu.vector_store %arg10[%28, %c0_23], %26 {strides = array<i32>} : memref<2x256xf32, #tpu.memory_space<vmem>>, vector<1x256xf32>,
    } else {
    }
    %c1_i32_8 = arith.constant 1 : i32
    %11 = arith.cmpi eq, %arg1, %c1_i32_8 : i32
    %c1_i32_9 = arith.constant 1 : i32
    %12 = arith.cmpi eq, %arg0, %c1_i32_9 : i32
    %13 = arith.andi %11, %12 : i1
    %14 = arith.extui %13 : i1 to i32
    %c0_i32_10 = arith.constant 0 : i32
    %15 = arith.cmpi ne, %14, %c0_i32_10 : i32
    scf.if %15 {
      %c0_11 = arith.constant 0 : index
      %c0_12 = arith.constant 0 : index
      %16 = vector.load %arg10[%c0_11, %c0_12] : memref<2x256xf32, #tpu.memory_space<vmem>>, vector<2x256xf32>
      %cst_13 = arith.constant dense<0.000000e+00> : vector<256xf32>
      %17 = vector.multi_reduction <add>, %16, %cst_13 [0] : vector<2x256xf32> to vector<256xf32>
      %18 = vector.shape_cast %17 : vector<256xf32> to vector<1x256xf32>
      %cst_14 = arith.constant 2.000000e+00 : f32
      %19 = vector.broadcast %cst_14 : f32 to vector<1x256xf32>
      %20 = arith.divf %18, %19 : vector<1x256xf32>
      %21 = vector.broadcast %20 : vector<1x256xf32> to vector<2x256xf32>
      %22 = arith.subf %16, %21 : vector<2x256xf32>
      %23 = arith.mulf %22, %22 : vector<2x256xf32>
      %cst_15 = arith.constant dense<0.000000e+00> : vector<256xf32>
      %24 = vector.multi_reduction <add>, %23, %cst_15 [0] : vector<2x256xf32> to vector<256xf32>
      %25 = vector.shape_cast %24 : vector<256xf32> to vector<1x256xf32>
      %cst_16 = arith.constant 2.000000e+00 : f32
      %26 = vector.broadcast %cst_16 : f32 to vector<1x256xf32>
      %27 = arith.divf %25, %26 : vector<1x256xf32>
      %cst_17 = arith.constant 9.99999974E-6 : f32
      %28 = vector.broadcast %cst_17 : f32 to vector<1x256xf32>
      %29 = arith.addf %27, %28 : vector<1x256xf32>
      %30 = math.rsqrt %29 : vector<1x256xf32>
      %31 = vector.broadcast %30 : vector<1x256xf32> to vector<2x256xf32>
      %32 = arith.mulf %22, %31 : vector<2x256xf32>
      %cst_18 = arith.constant 0.000000e+00 : f32
      %33 = vector.broadcast %cst_18 : f32 to vector<2x256xf32>
      %34 = arith.cmpf oge, %32, %33 : vector<2x256xf32>
      %cst_19 = arith.constant 0.00999999977 : f32
      %35 = vector.broadcast %cst_19 : f32 to vector<2x256xf32>
      %36 = arith.mulf %35, %32 : vector<2x256xf32>
      %37 = arith.select %34, %32, %36 : vector<2x256xi1>, vector<2x256xf32>
      %c0_20 = arith.constant 0 : index
      %c768 = arith.constant 768 : index
      %38 = vector.load %arg7[%c0_20, %c768] : memref<1x1280xf32, #tpu.memory_space<vmem>>, vector<1x384xf32>
      %39 = arith.truncf %37 : vector<2x256xf32> to vector<2x256xbf16>
      %c0_21 = arith.constant 0 : index
      %c0_22 = arith.constant 0 : index
      %40 = vector.load %arg5[%c0_21, %c0_22] : memref<256x384xbf16, #tpu.memory_space<vmem>>, vector<256x384xbf16>
      %cst_23 = arith.constant dense<0.000000e+00> : vector<2x384xf32>
      %41 = tpu.matmul %39, %40, %cst_23 {dimension_numbers = #tpu.dot_dimension_numbers<[1], [0], [0], [1], [0, 0, 1, 1], [], []>} : vector<2x256xbf16>, vector<256x384xbf16>, vector<2x384xf32> -> vector<2x384xf32>
      %42 = vector.broadcast %38 : vector<1x384xf32> to vector<2x384xf32>
      %43 = arith.addf %41, %42 : vector<2x384xf32>
      %44 = vector.extract_strided_slice %43 {offsets = [0, 0], sizes = [2, 256], strides = [1, 1]} : vector<2x384xf32> to vector<2x256xf32>
      %cst_24 = arith.constant 0.000000e+00 : f32
      %45 = vector.broadcast %cst_24 : f32 to vector<2x256xf32>
      %46 = arith.cmpf oge, %44, %45 : vector<2x256xf32>
      %cst_25 = arith.constant 0.00999999977 : f32
      %47 = vector.broadcast %cst_25 : f32 to vector<2x256xf32>
      %48 = arith.mulf %47, %44 : vector<2x256xf32>
      %49 = arith.select %46, %44, %48 : vector<2x256xi1>, vector<2x256xf32>
      %50 = vector.extract_strided_slice %43 {offsets = [0, 256], sizes = [2, 128], strides = [1, 1]} : vector<2x384xf32> to vector<2x128xf32>
      %c0_26 = arith.constant 0 : index
      %c0_27 = arith.constant 0 : index
      %51 = vector.load %arg8[%c0_26, %c0_27] : memref<2x256xf32, #tpu.memory_space<vmem>>, vector<2x128xf32>
      tpu.vector_store %arg8[%c0_26, %c0_27], %50 {strides = array<i32>} : memref<2x256xf32, #tpu.memory_space<vmem>>, vector<2x128xf32>,
      %c0_28 = arith.constant 0 : index
      %c1152 = arith.constant 1152 : index
      %52 = vector.load %arg7[%c0_28, %c1152] : memref<1x1280xf32, #tpu.memory_space<vmem>>, vector<1x128xf32>
      %53 = arith.truncf %49 : vector<2x256xf32> to vector<2x256xbf16>
      %c0_29 = arith.constant 0 : index
      %c0_30 = arith.constant 0 : index
      %54 = vector.load %arg6[%c0_29, %c0_30] : memref<256x128xbf16, #tpu.memory_space<vmem>>, vector<256x128xbf16>
      %cst_31 = arith.constant dense<0.000000e+00> : vector<2x128xf32>
      %55 = tpu.matmul %53, %54, %cst_31 {dimension_numbers = #tpu.dot_dimension_numbers<[1], [0], [0], [1], [0, 0, 1, 1], [], []>} : vector<2x256xbf16>, vector<256x128xbf16>, vector<2x128xf32> -> vector<2x128xf32>
      %56 = vector.broadcast %52 : vector<1x128xf32> to vector<2x128xf32>
      %57 = arith.addf %55, %56 : vector<2x128xf32>
      %c0_32 = arith.constant 0 : index
      %c128 = arith.constant 128 : index
      %58 = vector.load %arg8[%c0_32, %c128] : memref<2x256xf32, #tpu.memory_space<vmem>>, vector<2x128xf32>
      tpu.vector_store %arg8[%c0_32, %c128], %57 {strides = array<i32>} : memref<2x256xf32, #tpu.memory_space<vmem>>, vector<2x128xf32>,
    } else {
    }
    return
  }
  func.func @transform_0(%arg0: i32, %arg1: i32) -> (i32, i32, i32) {
    %c0_i32 = arith.constant 0 : i32
    %c0_i32_0 = arith.constant 0 : i32
    return %arg0, %c0_i32, %arg1 : i32, i32, i32
  }
  func.func @transform_1(%arg0: i32, %arg1: i32) -> (i32, i32) {
    %c0_i32 = arith.constant 0 : i32
    %c0_i32_0 = arith.constant 0 : i32
    %c0_i32_1 = arith.constant 0 : i32
    return %c0_i32, %c0_i32_0 : i32, i32
  }
  func.func @transform_2(%arg0: i32, %arg1: i32) -> (i32, i32) {
    %c0_i32 = arith.constant 0 : i32
    %c0_i32_0 = arith.constant 0 : i32
    %c0_i32_1 = arith.constant 0 : i32
    return %c0_i32, %c0_i32_0 : i32, i32
  }
  func.func @transform_3(%arg0: i32, %arg1: i32) -> (i32, i32) {
    %c0_i32 = arith.constant 0 : i32
    %c0_i32_0 = arith.constant 0 : i32
    %c0_i32_1 = arith.constant 0 : i32
    return %c0_i32, %c0_i32_0 : i32, i32
  }
  func.func @transform_4(%arg0: i32, %arg1: i32) -> (i32, i32) {
    %c0_i32 = arith.constant 0 : i32
    %c0_i32_0 = arith.constant 0 : i32
    %c0_i32_1 = arith.constant 0 : i32
    return %c0_i32, %c0_i32_0 : i32, i32
  }
  func.func @transform_5(%arg0: i32, %arg1: i32) -> (i32, i32) {
    %c0_i32 = arith.constant 0 : i32
    %c0_i32_0 = arith.constant 0 : i32
    %c0_i32_1 = arith.constant 0 : i32
    return %c0_i32, %c0_i32_0 : i32, i32
  }
  func.func @transform_6(%arg0: i32, %arg1: i32) -> (i32, i32) {
    %c0_i32 = arith.constant 0 : i32
    %c0_i32_0 = arith.constant 0 : i32
    %c0_i32_1 = arith.constant 0 : i32
    return %c0_i32, %c0_i32_0 : i32, i32
  }
}

</mosaic_0001>

<bundles_post_ra>
// kernel: tpu_custom_call.1
= control target key start
LH: loop header
LB: loop body
LE: loop exit
PB: predicated region body
PF: predicated region fallthrough
CT: control target
= control target key end

     0   :  { %s3036_s0 = inlined_call_operand.hbm [shape: f32[2,4,256], index: 0, kind: input, shape index: {}]   ;;  %s3037_s1 = inlined_call_operand.hbm [shape: bf16[4,512], index: 1, kind: input, shape index: {}]   ;;  %s3038_s2 = inlined_call_operand.hbm [shape: bf16[512,256], index: 2, kind: input, shape index: {}]   ;;  %s3039_s3 = inlined_call_operand.hbm [shape: bf16[256,384], index: 3, kind: input, shape index: {}]   ;;  %s3040_s4 = inlined_call_operand.hbm [shape: bf16[256,128], index: 4, kind: input, shape index: {}]   ;;  %s3041_s5 = inlined_call_operand.hbm [shape: f32[1,1280], index: 5, kind: input, shape index: {}]   ;;  %s3042_s6 = inlined_call_operand.hbm [shape: f32[2,256], index: 6, kind: output, shape index: {}]  }
   0x1   :  { %3047 = sst [smem:[#allocation21_spill]] %s3037_s1 }
   0x2   :  { %3048 = sst [smem:[#allocation22_spill]] %s3038_s2 }
   0x3   :  { %3049 = sst [smem:[#allocation23_spill]] %s3039_s3 }
   0x4   :  { %3050 = sst [smem:[#allocation24_spill]] %s3040_s4 }
   0x5   :  { %11 = vsyncpa [#allocation5], 0 }
   0x6   :  { %13 = vsyncpa [#allocation5 + $0x1], 0 }
   0x7   :  { %14 = vsyncpa [#allocation8], 0 }
   0x8   :  { %15 = vsyncpa [#allocation11], 0 }
   0x9   :  { %16 = vsyncpa [#allocation14], 0 }
   0xa   :  { %17 = vsyncpa [#allocation6], 0  ;;  %s2759_s21 = smov 0   ;;  %s2761_s22 = smov 0  }
   0xb   :  { %s2763_s23 = smov 0   ;;  %s2765_s24 = smov 0  }
   0xc   :  { %s2767_s25 = smov 0   ;;  %s2769_s26 = smov 0  }
   0xd   :  { %s2771_s27 = smov 0   ;;  %s2773_s28 = smov 0  }
   0xe LB: > { %s3046_s29 = sadd.s32 4294967295, %s2703_s28   ;;  %p1913_p0 = scmp.ge.s32.totalorder %s2703_s28, 1  ;;  %s2703_s28 = sphi %s2773_s28, %s23_s28   ;;  %s2699_s27 = sphi %s2771_s27, %s3073_s27   ;;  %s2695_s26 = sphi %s2769_s26, %s3072_s26   ;;  %s2691_s25 = sphi %s2767_s25, %s3071_s25   ;;  %s2687_s24 = sphi %s2765_s24, %s3070_s24   ;;  %s2683_s23 = sphi %s2763_s23, %s3069_s23   ;;  %s2679_s22 = sphi %s2761_s22, %s3068_s22   ;;  %s2675_s21 = sphi %s2759_s21, %s3067_s21  }
   0xf   : > { %p2803_p1 = scmp.eq.s32.totalorder %s3046_s29, 0  ;;  %p194_p2 = scmp.lt.s32.totalorder %s2703_s28, 5 }
  0x10   : > { %s2705_s8 = smov [#allocation7]   ;;  %s2706_s10 = smov [#allocation10]  }
  0x11   : > { %s3051_s30 = scalar_select %p2803_p1, 1, 0 }
  0x12   : > { %p2808_p3 = pnand %p1913_p0, %p194_p2  ;;  %s207_s9 = sshll.u32 %s2705_s8, 4  ;;  %s208_s9 = int_to_ptr.vmem [resolvable:$true] %s207_s9 }
  0x13   : > { %s230_s11 = sshll.u32 %s2706_s10, 4  ;;  %s2707_s13 = smov [#allocation9]   ;;  %s231_s11 = int_to_ptr.vmem [resolvable:$true] %s230_s11 }
  0x14   : > { %s3052_s7 = scalar_select %p2808_p3, 1, 0 }
  0x15   : > { %p2142_p4 = pneg %p2808_p3  ;;  %s217_s14 = sshll.u32 %s2707_s13, 4  ;;  %s218_s14 = int_to_ptr.vmem [resolvable:$true] %s217_s14 }
  0x16   : > { %s2450_s16 = scalar_lea.vmem %s208_s9, 128  ;;  %p2458_p10 = scmp.lt.s32.totalorder %s208_s9, %s208_s9 }
  0x17   : > { %p2816_p5 = pnand %p2142_p4, %p2803_p1  ;;  %p2451_p7 = scmp.ne.s32.totalorder %s208_s9, %s2450_s16 }
  0x18   : > { %p2459_p11 = scmp.lt.s32.totalorder %s2450_s16, %s2450_s16 }
  0x19   : > { %p2822_p6 = pneg %p2816_p5 }
  0x1a   : > { %p2460_p12 = por %p2459_p11, %p2458_p10 }
  0x1b   : > { %p2453_p8 = pnand %p2451_p7, %p2822_p6 }
  0x1d   : > { %p2454_p9 = pneg %p2453_p8 }
  0x1f   : > { %p2461_p13 = pnand %p2460_p12, %p2454_p9 }
  0x21   : > { %2464 = shalt.err (!%p2461_p13)
}
  0x22   : > { %s3055_s1 = sld [smem:[#allocation21_spill]]  ;;  %s2476_s19 = scalar_lea.vmem %s231_s11, 6144 }
  0x23   : > { %p2477_p0 = scmp.ne.s32.totalorder %s231_s11, %s2476_s19  ;;  %p2484_p3 = scmp.lt.s32.totalorder %s231_s11, %s231_s11 }
  0x24   : > { %p2485_p7 = scmp.lt.s32.totalorder %s2476_s19, %s2476_s19 }
  0x25   : > { %p2479_p2 = pnand %p2477_p0, %p2822_p6 }
  0x26   : > { %p2486_p8 = por %p2485_p7, %p2484_p3 }
  0x27   : > { %p2480_p4 = pneg %p2479_p2 }
  0x28   : > { %2145 = dma.hbm_to_vmem [thread:$0]  (!%p2816_p5), %s3055_s1, 128, %s208_s9, [#allocation8]  }
  0x29   : > { %p2487_p1 = pnand %p2486_p8, %p2480_p4 }
  0x2b   : > { %2490 = shalt.err (!%p2487_p1)
}
  0x2c   : > { %s2708_s20 = smov 192   ;;  %s2709_s8 = smov 12  }
  0x2d   : > { %s3056_s3 = sld [smem:[#allocation23_spill]]  ;;  %s2502_s9 = scalar_lea.vmem %s218_s14, 8192 }
  0x2e   : > { %p2503_p9 = scmp.ne.s32.totalorder %s218_s14, %s2502_s9  ;;  %p2510_p12 = scmp.lt.s32.totalorder %s218_s14, %s218_s14 }
  0x2f   : > { %p2511_p13 = scmp.lt.s32.totalorder %s2502_s9, %s2502_s9 }
  0x30   : > { %p2505_p10 = pnand %p2503_p9, %p2822_p6 }
  0x31   : > { %p2512_p3 = por %p2511_p13, %p2510_p12 }
  0x32   : > { %p2506_p11 = pneg %p2505_p10 }
  0x33   : > { %2151 = dma.hbm_to_vmem [thread:$0]  (!%p2816_p5), %s3056_s3, 6144, %s231_s11, [#allocation11], %s2708_s20, %s2708_s20, %s2709_s8  }
  0x34   : > { %p2513_p0 = pnand %p2512_p3, %p2506_p11 }
  0x36   : > { %2516 = shalt.err (!%p2513_p0)
}
  0x37   : > { %s2710_s16 = smov 128   ;;  %s2711_s17 = smov 8  }
  0x38   : > { %s3057_s2 = sld [smem:[#allocation22_spill]]  ;;  %s2712_s11 = smov [#allocation12]  }
  0x39   : > { %s243_s20 = sshll.u32 %s2712_s11, 4  ;;  %s244_s20 = int_to_ptr.vmem [resolvable:$true] %s243_s20 }
  0x3a   : > { %s2528_s8 = scalar_lea.vmem %s244_s20, 2048  ;;  %p2536_p7 = scmp.lt.s32.totalorder %s244_s20, %s244_s20 }
  0x3b   : > { %p2529_p1 = scmp.ne.s32.totalorder %s244_s20, %s2528_s8  ;;  %p2537_p8 = scmp.lt.s32.totalorder %s2528_s8, %s2528_s8 }
  0x3d   : > { %p2531_p2 = pnand %p2529_p1, %p2822_p6  ;;  %p2538_p9 = por %p2537_p8, %p2536_p7 }
  0x3e   : > { %2148 = dma.hbm_to_vmem [thread:$0]  (!%p2816_p5), %s3057_s2, 8192, %s218_s14, [#allocation8], %s2710_s16, %s2710_s16, %s2711_s17  }
  0x3f   : > { %p2532_p4 = pneg %p2531_p2 }
  0x41   : > { %p2539_p10 = pnand %p2538_p9, %p2532_p4 }
  0x43   : > { %2542 = shalt.err (!%p2539_p10)
}
  0x44   : > { %s2713_s10 = smov 64   ;;  %s2714_s13 = smov 4  }
  0x45   : > { %s3058_s4 = sld [smem:[#allocation24_spill]]  ;;  %s2715_s16 = smov [#allocation13]  }
  0x46   : > { %s257_s17 = sshll.u32 %s2715_s16, 4  ;;  %s258_s17 = int_to_ptr.vmem [resolvable:$true] %s257_s17 }
  0x47   : > { %s2554_s18 = scalar_lea.vmem %s258_s17, 160  ;;  %p2562_p3 = scmp.lt.s32.totalorder %s258_s17, %s258_s17 }
  0x48   : > { %p2555_p11 = scmp.ne.s32.totalorder %s258_s17, %s2554_s18  ;;  %p2563_p0 = scmp.lt.s32.totalorder %s2554_s18, %s2554_s18 }
  0x4a   : > { %p2557_p12 = pnand %p2555_p11, %p2822_p6  ;;  %p2564_p1 = por %p2563_p0, %p2562_p3 }
  0x4b   : > { %2154 = dma.hbm_to_vmem [thread:$0]  (!%p2816_p5), %s3058_s4, 2048, %s244_s20, [#allocation11], %s2713_s10, %s2713_s10, %s2714_s13  }
  0x4c   : > { %p2558_p13 = pneg %p2557_p12 }
  0x4e   : > { %p2565_p2 = pnand %p2564_p1, %p2558_p13 }
  0x50   : > { %2568 = shalt.err (!%p2565_p2)
}
  0x51   : > { %2157 = dma.hbm_to_vmem [thread:$0]  (!%p2816_p5), %s3041_s5, 160, %s258_s17, [#allocation14]  }
  0x52   : > { %s32_s15 = sadd.s32 1, %s2695_s26  ;;  %s35_s12 = sadd.s32 1, %s2699_s27 }
  0x53   : > { %p33_p6 = scmp.ge.s32.totalorder %s32_s15, 2  ;;  %s44_s20 = sadd.s32 1, %s2683_s23 }
  0x54   : > { %p51_p4 = scmp.ne.s32.totalorder %s2683_s23, %s2679_s22  ;;  %p52_p7 = scmp.eq.s32.totalorder %s2703_s28, 0 }
  0x55   : > { %s3075_s15 = smov (%p33_p6, %s32_s15), 0  ;;  %s3077_s12 = smov (!%p33_p6, %s35_s12), %s2699_s27 }
  0x56   : > { %s40_s8 = ssub.s32 %s2695_s26, %s3075_s15  ;;  %p37_p8 = scmp.ge.s32.totalorder %s3077_s12, 2 }
  0x57   : > { %p57_p9 = scmp.ne.s32.totalorder %s2679_s22, %s2675_s21  ;;  %p2874_p10 = por %p52_p7, %p51_p4 }
  0x58   : > { %p2167_p5 = scmp.lt.s32.totalorder %s2703_s28, 4  ;;  %s3079_s12 = smov (%p37_p8, %s3077_s12), 0 }
  0x59   : > { %p3060_p11 = scmp.ne.s32.totalorder %s3051_s30, 0  ;;  %s268_s9 = sand.u32 1, %s2683_s23  }
  0x5a   : > { %s39_s14 = ssub.s32 %s2699_s27, %s3079_s12  ;;  %s1920_s17 = sshll.u32 %s268_s9, 2 }
  0x5b   : > { %p2883_p12 = por %p3060_p11, %p57_p9  ;;  %s41_s16 = sor.u32 %s40_s8, %s39_s14 }
  0x5c   : > { %p42_p13 = scmp.eq.s32.totalorder %s41_s16, 0  ;;  %s1921_s21 = sshll.u32 %s2699_s27, 1 }
  0x5d   : > { %s272_s18 = scalar_lea.vmem [#allocation4], %s1920_s17  ;;  %s277_s29 = sadd.s32 %s2695_s26, %s1921_s21 }
  0x5e   : > { %s281_s19 = sshll.u32 %s272_s18, 4  ;;  %s1922_s1 = sshll.u32 %s277_s29, 6  ;;  %s282_s19 = int_to_ptr.vmem [resolvable:$true] %s281_s19 }
  0x5f   : > { %s2892_s11 = scalar_select %p42_p13, %s2683_s23, %s44_s20  }
  0x60   : > { %p2899_p3 = pnand %p2167_p5, %p2874_p10  ;;  %s279_s8 = scalar_lea.hbm %s3036_s0, %s1922_s1 }
  0x61   : > { %s269_s14 = scalar_lea.sflag [#allocation5], %s268_s9  ;;  %s2582_s16 = scalar_lea.vmem %s282_s19, 64 }
  0x62   : > { %p2571_p0 = pneg %p2899_p3  ;;  %p2583_p1 = scmp.ne.s32.totalorder %s282_s19, %s2582_s16 }
  0x63   : > { %s2716_s20 = smov [#allocation4]  }
  0x64   : > { %p2585_p2 = pnand %p2583_p1, %p2571_p0  ;;  %s2587_s29 = sshll.u32 %s2716_s20, 4  ;;  %s2588_s29 = int_to_ptr.vmem [resolvable:$false] %s2587_s29 }
  0x65   : > { %s2589_s10 = scalar_lea.vmem %s2588_s29, 128  ;;  %p2590_p4 = scmp.lt.s32.totalorder %s282_s19, %s2588_s29 }
  0x66   : > { %p2586_p6 = pneg %p2585_p2  ;;  %p2591_p7 = scmp.lt.s32.totalorder %s2589_s10, %s2582_s16 }
  0x68   : > { %p2592_p8 = por %p2591_p7, %p2590_p4 }
  0x6a   : > { %p2593_p9 = pnand %p2592_p8, %p2586_p6 }
  0x6c   : > { %2596 = shalt.err (!%p2593_p9)
}
  0x6d   : > { %2161 = dma.hbm_to_vmem [thread:$0]  (!%p2899_p3), %s279_s8, 64, %s282_s19, %s269_s14  }
  0x6e   : > { %p3063_p10 = scmp.ne.s32.totalorder %s3052_s7, 0 }
  0x6f   : > { %s292_s1 = sand.u32 (!%p3063_p10), 1, %s2679_s22  }
  0x70   : > { %290 = sbr.rel (%p3063_p10) target bundleno = 1352 (0x548), region = 44  ;;  %s1924_s3 = sshll.u32 (!%p3063_p10), %s292_s1, 2 }
  0x71   : > { %s293_s4 = scalar_lea.sflag (!%p3063_p10), [#allocation5], %s292_s1  ;;  %s296_s9 = scalar_lea.vmem (!%p3063_p10), [#allocation4], %s1924_s3 }
  0x75   : > { %2654 = dma.done.wait (%p2883_p12), %s293_s4, 64  }
  0x76   : > { %2656 = vsyncadd (%p2883_p12), %s293_s4, 4294967232  ;;  %p3064_p5 = scmp.ne.s32.totalorder %s3051_s30, 0 }
  0x78   : > { %2658 = dma.done.wait (%p3064_p5), [#allocation8], 8320  }
  0x79   : > { %2660 = vsyncadd (%p3064_p5), [#allocation8], 4294958976 }
  0x7a   : > { %2662 = dma.done.wait (%p3064_p5), [#allocation11], 8192  }
  0x7b   : > { %2664 = vsyncadd (%p3064_p5), [#allocation11], 4294959104 }
  0x7c   : > { %2666 = dma.done.wait (%p3064_p5), [#allocation14], 160  }
  0x7d   : > { %2668 = vsyncadd (%p3064_p5), [#allocation14], 4294967136  ;;  %p1930_p11 = scmp.ne.s32.totalorder %s2687_s24, 0 }
  0x7f   : > { %344 = sbr.rel (%p1930_p11) target bundleno = 134 (0x86), region = 72 }
  0x84   : > { %vm345_vm0 = vcmask 24576   ;;  %v2717_v0 = vmov 0.0  }
  0x85   : > { %346 = vst.msk [vmem:[#allocation2] sm:$0x1] %vm345_vm0, %v2717_v0 }
  0x86 PF: > { %v348_v1 = vld [vmem:[%s296_s9] sm:$0xf]  ;;  %vm349_vm1 = vcmask 1043456   ;;  %v2718_v3 = vmov 0   ;;  %v354_v4 = vlaneseq  ;;  %v2719_v8 = vmov 1966171168  }
  0x87   : > { %v350_v2 = vsel %vm349_vm1, %v348_v1, 0.0  ;;  %2257 = vset.pattern.permute.xlu0 %v2718_v3  ;;  %v373_v9 = vunpack.c.l.s4 %v2719_v8  ;;  %p421_p12 = scmp.eq.s32.totalorder %s2687_s24, 1  ;;  %vm419_vm2 = vcmask 24576   ;;  %p1931_p13 = scmp.ne.s32.totalorder %s2687_s24, 1 }
  0x88   : > { %351 = vadd.xlane.f32.xlu0 %v350_v2  ;;  %v2931_v5 = vshrl.u32 %v354_v4, 7  ;;  %v398_v6 = vand.u32 127, %v354_v4  ;;  %s1071_s2 = sshra.s32 (!%p1931_p13), %s2691_s25, 1  ;;  %s1074_s30 = sand.u32 (!%p1931_p13), 1, %s2691_s25 }
  0x89   : > { %v374_v10 = vunpack.c.0.s8 %v373_v9  ;;  %s2071_s7 = sshll.u32 (!%p1931_p13), %s1071_s2, 2 }
  0x8a   : > { %v401_v7 = vsub.s32 %v398_v6, %v2931_v5  ;;  %v2936_v11 = vsub.s32 0, %v2931_v5  ;;  %v2939_v12 = vsub.s32 1, %v2931_v5  ;;  %v2942_v13 = vsub.s32 2, %v2931_v5  ;;  %s1077_s13 = sadd.s32 (!%p1931_p13), %s2071_s7, %s1074_s30 }
  0x8b   : > { %v368_v14 = vsub.s32 3, %v2931_v5  ;;  %v2946_v16 = vsub.s32 %v374_v10, %v2931_v5  ;;  %s1078_s17 = scalar_lea.vmem (!%p1931_p13), [#allocation3], %s1077_s13 }
  0x8c   : > { %v347_v30 = vld [vmem:[#allocation2] sm:$0x1] }
 0x111   : > { %v352_v15 = vpop.xlane.xlu0 %351 }
 0x112   : > { %v357_v17 = vrot.slane %v352_v15, %v2936_v11  ;;  %v361_v18 = vrot.slane %v352_v15, %v2939_v12  ;;  %v365_v19 = vrot.slane %v352_v15, %v2942_v13  ;;  %v369_v20 = vrot.slane %v352_v15, %v368_v14 }
 0x114   : > { %v370_v21 = vcombine.low %v357_v17, %v361_v18  ;;  %v371_v22 = vcombine.low %v365_v19, %v369_v20 }
 0x116   : > { %v378_v23 = vrot.slane %v370_v21, %v2946_v16  ;;  %v385_v24 = vrot.slane %v371_v22, %v2946_v16 }
 0x118   : > { %v386_v25 = vcombine.low %v378_v23, %v385_v24 }
 0x11a   : > { %v393_v26 = vrot.slane %v386_v25, %v2946_v16 }
 0x11c   : > { %395 = vperm.xlu0 %2257, %v393_v26  }
 0x197   : > { %v396_v27 = vpop.permute.xlu0 %395 }
 0x198   : > { %v402_v28 = vrot.slane %v396_v27, %v401_v7 }
 0x19a   : > { %v409_v29 = vrot.slane %v402_v28, %v2946_v16 }
 0x19c   : > { %v416_v31 = vrot.slane %v409_v29, %v2946_v16  ;;  %424 = sbr.rel (%p1931_p13) target bundleno = 838 (0x346), region = 76 }
 0x19e   : > { %v418_v32 = vadd.f32 %v416_v31, %v347_v30 }
 0x1a0   : > { %420 = vst.msk [vmem:[#allocation2] sm:$0x1] %vm419_vm2, %v418_v32 }
 0x1a1   : > { %v429_v33 = vld [vmem:[#allocation7] sm:$0xff]  ;;  %v2720_v34 = vmov 1983009808   ;;  %v2721_v36 = vmov 0   ;;  %vm473_vm3 = vcmask 1041408   ;;  %vm469_vm4 = vcmask 31744  }
 0x1a2   : > { %v433_v35 = vunpack.c.l.s4 %v2720_v34  ;;  %518 = vmatprep.mubr.bf16.mxu0 %v2721_v36  ;;  %559 = vmatprep.mubr.bf16.mxu1 %v2721_v36  ;;  %v431_v38 = vcombine.high %v429_v33, %v429_v33  ;;  %v2261_v43 = vld [vmem:[#allocation9 + $0x74] ss:$8 sps:$4 sm:$0xff]   ;;  %v2259_v50 = vld [vmem:[#allocation9 + $0x70] ss:$8 sps:$4 sm:$0xff]   ;;  %v2267_v52 = vld [vmem:[#allocation9 + $0x64] ss:$8 sps:$4 sm:$0xff]  }
 0x1a3   : > { %v2264_v48 = vld [vmem:[#allocation9 + $0x174] ss:$8 sps:$4 sm:$0xff]   ;;  %v2262_v51 = vld [vmem:[#allocation9 + $0x170] ss:$8 sps:$4 sm:$0xff]   ;;  %v2270_v53 = vld [vmem:[#allocation9 + $0x164] ss:$8 sps:$4 sm:$0xff]  }
 0x1a4   : > { %v434_v37 = vunpack.c.0.s8 %v433_v35  ;;  %v2265_v54 = vld [vmem:[#allocation9 + $0x60] ss:$8 sps:$4 sm:$0xff]   ;;  %v2273_v56 = vld [vmem:[#allocation9 + $0x54] ss:$8 sps:$4 sm:$0xff]   ;;  %v2271_v58 = vld [vmem:[#allocation9 + $0x50] ss:$8 sps:$4 sm:$0xff]  }
 0x1a5   : > { %v2268_v55 = vld [vmem:[#allocation9 + $0x160] ss:$8 sps:$4 sm:$0xff]   ;;  %v2276_v57 = vld [vmem:[#allocation9 + $0x154] ss:$8 sps:$4 sm:$0xff]   ;;  %v2274_v59 = vld [vmem:[#allocation9 + $0x150] ss:$8 sps:$4 sm:$0xff]  }
 0x1a6   : > { %v437_v39 = vsub.s32 %v434_v37, %v2931_v5  ;;  %v2279_v60 = vld [vmem:[#allocation9 + $0x44] ss:$8 sps:$4 sm:$0xff]   ;;  %v2277_v62 = vld [vmem:[#allocation9 + $0x40] ss:$8 sps:$4 sm:$0xff]   ;;  %v2285_v0 = vld [vmem:[#allocation9 + $0x34] ss:$8 sps:$4 sm:$0xff]  }
 0x1a7   : > { %v427_v42 = vld [vmem:[#allocation2] sm:$0x1]  ;;  %v2282_v61 = vld [vmem:[#allocation9 + $0x144] ss:$8 sps:$4 sm:$0xff]   ;;  %v2288_v1 = vld [vmem:[#allocation9 + $0x134] ss:$8 sps:$4 sm:$0xff]  }
 0x1a8   : > { %v438_v40 = vrot.slane %v429_v33, %v437_v39  ;;  %v445_v41 = vrot.slane %v431_v38, %v437_v39  ;;  %v428_v49 = vpack.c.bf16 %v427_v42, %v427_v42  ;;  %v2280_v63 = vld [vmem:[#allocation9 + $0x140] ss:$8 sps:$4 sm:$0xff]   ;;  %v2283_v2 = vld [vmem:[#allocation9 + $0x30] ss:$8 sps:$4 sm:$0xff]   ;;  %v2291_v6 = vld [vmem:[#allocation9 + $0x24] ss:$8 sps:$4 sm:$0xff]  }
 0x1a9   : > { %v2286_v3 = vld [vmem:[#allocation9 + $0x130] ss:$8 sps:$4 sm:$0xff]   ;;  %v2294_v7 = vld [vmem:[#allocation9 + $0x124] ss:$8 sps:$4 sm:$0xff]   ;;  %v2289_v8 = vld [vmem:[#allocation9 + $0x20] ss:$8 sps:$4 sm:$0xff]  }
 0x1aa   : > { %v446_v44 = vcombine.high %v438_v40, %v438_v40  ;;  %v447_v45 = vcombine.high %v445_v41, %v445_v41  ;;  %v475_v46 = vsel %vm473_vm3, %v438_v40, 0  ;;  %v481_v47 = vsel %vm473_vm3, %v445_v41, 0  ;;  %v2292_v9 = vld [vmem:[#allocation9 + $0x120] ss:$8 sps:$4 sm:$0xff]   ;;  %v2297_v10 = vld [vmem:[#allocation9 + $0x14] ss:$8 sps:$4 sm:$0xff]  }
 0x1ab   : > { %v2300_v15 = vld [vmem:[#allocation9 + $0x114] ss:$8 sps:$4 sm:$0xff]   ;;  %v2295_v17 = vld [vmem:[#allocation9 + $0x10] ss:$8 sps:$4 sm:$0xff]   ;;  %v2303_v19 = vld [vmem:[#allocation9 + $0x4] ss:$8 sps:$4 sm:$0xff]  }
 0x1ac   : > { %1932 = vmatprep.subr.msk.bf16.mxu0 %vm473_vm3, %v446_v44  ;;  %1934 = vmatprep.subr.msk.bf16.mxu1 %vm473_vm3, %v447_v45  ;;  %v2298_v18 = vld [vmem:[#allocation9 + $0x110] ss:$8 sps:$4 sm:$0xff]   ;;  %v2306_v20 = vld [vmem:[#allocation9 + $0x104] ss:$8 sps:$4 sm:$0xff]   ;;  %v2301_v21 = vld [vmem:[#allocation9] ss:$8 sps:$4 sm:$0xff]  }
 0x1ad   : > { %501 = vmatpush1.bf16.msra.mxu0 %v475_v46  ;;  %542 = vmatpush1.bf16.msra.mxu1 %v481_v47  ;;  %v2304_v22 = vld [vmem:[#allocation9 + $0x100] ss:$8 sps:$4 sm:$0xff]   ;;  %v2309_v23 = vld [vmem:[#allocation9 + $0xf4] ss:$8 sps:$4 sm:$0xff]   ;;  %v2307_v25 = vld [vmem:[#allocation9 + $0xf0] ss:$8 sps:$4 sm:$0xff]  }
 0x1ae   : > { %967 = vmatprep.subr.bf16.mxu0 %v2261_v43  ;;  %1008 = vmatprep.subr.bf16.mxu1 %v2264_v48  ;;  %v2312_v24 = vld [vmem:[#allocation9 + $0x1f4] ss:$8 sps:$4 sm:$0xff]   ;;  %v2310_v26 = vld [vmem:[#allocation9 + $0x1f0] ss:$8 sps:$4 sm:$0xff]   ;;  %v2315_v27 = vld [vmem:[#allocation9 + $0xe4] ss:$8 sps:$4 sm:$0xff]  }
 0x1af   : > { %v2318_v28 = vld [vmem:[#allocation9 + $0x1e4] ss:$8 sps:$4 sm:$0xff]   ;;  %v2313_v29 = vld [vmem:[#allocation9 + $0xe0] ss:$8 sps:$4 sm:$0xff]   ;;  %v2321_v31 = vld [vmem:[#allocation9 + $0xd4] ss:$8 sps:$4 sm:$0xff]  }
 0x1b0   : > { %1933 = vmatmul.mubr.msk.bf16.vlgmr.msra.gmra.mxu0 %vm469_vm4, %v428_v49  ;;  %1935 = vmatmul.mubr.msk.bf16.vlgmr.msra.gmra.mxu1 %vm469_vm4, %v428_v49  ;;  %v2316_v30 = vld [vmem:[#allocation9 + $0x1e0] ss:$8 sps:$4 sm:$0xff]   ;;  %v2324_v32 = vld [vmem:[#allocation9 + $0x1d4] ss:$8 sps:$4 sm:$0xff]   ;;  %v2319_v33 = vld [vmem:[#allocation9 + $0xd0] ss:$8 sps:$4 sm:$0xff]  }
 0x1b1   : > { %968 = vmatpush1.bf16.msra.mxu0 %v2259_v50  ;;  %1009 = vmatpush1.bf16.msra.mxu1 %v2262_v51  ;;  %v2322_v34 = vld [vmem:[#allocation9 + $0x1d0] ss:$8 sps:$4 sm:$0xff]   ;;  %v2327_v35 = vld [vmem:[#allocation9 + $0xc4] ss:$8 sps:$4 sm:$0xff]   ;;  %v2325_v37 = vld [vmem:[#allocation9 + $0xc0] ss:$8 sps:$4 sm:$0xff]  }
 0x1b2   : > { %969 = vmatprep.subr.bf16.mxu0 %v2267_v52  ;;  %1010 = vmatprep.subr.bf16.mxu1 %v2270_v53  ;;  %v2330_v36 = vld [vmem:[#allocation9 + $0x1c4] ss:$8 sps:$4 sm:$0xff]   ;;  %v2328_v38 = vld [vmem:[#allocation9 + $0x1c0] ss:$8 sps:$4 sm:$0xff]   ;;  %v2333_v39 = vld [vmem:[#allocation9 + $0xb4] ss:$8 sps:$4 sm:$0xff]  }
 0x1b3   : > { %v2336_v40 = vld [vmem:[#allocation9 + $0x1b4] ss:$8 sps:$4 sm:$0xff]   ;;  %v2331_v41 = vld [vmem:[#allocation9 + $0xb0] ss:$8 sps:$4 sm:$0xff]   ;;  %v2339_v43 = vld [vmem:[#allocation9 + $0xa4] ss:$8 sps:$4 sm:$0xff]  }
 0x1b4   : > { %v2334_v42 = vld [vmem:[#allocation9 + $0x1b0] ss:$8 sps:$4 sm:$0xff]   ;;  %v2342_v44 = vld [vmem:[#allocation9 + $0x1a4] ss:$8 sps:$4 sm:$0xff]   ;;  %v2337_v45 = vld [vmem:[#allocation9 + $0xa0] ss:$8 sps:$4 sm:$0xff]  }
 0x1b5   : > { %970 = vmatpush1.bf16.msra.mxu0 %v2265_v54  ;;  %1011 = vmatpush1.bf16.msra.mxu1 %v2268_v55  ;;  %v2340_v46 = vld [vmem:[#allocation9 + $0x1a0] ss:$8 sps:$4 sm:$0xff]   ;;  %v2345_v47 = vld [vmem:[#allocation9 + $0x94] ss:$8 sps:$4 sm:$0xff]   ;;  %v2343_v49 = vld [vmem:[#allocation9 + $0x90] ss:$8 sps:$4 sm:$0xff]  }
 0x1b6   : > { %971 = vmatprep.subr.bf16.mxu0 %v2273_v56  ;;  %1012 = vmatprep.subr.bf16.mxu1 %v2276_v57  ;;  %v2348_v48 = vld [vmem:[#allocation9 + $0x194] ss:$8 sps:$4 sm:$0xff]   ;;  %v2346_v50 = vld [vmem:[#allocation9 + $0x190] ss:$8 sps:$4 sm:$0xff]   ;;  %v2351_v51 = vld [vmem:[#allocation9 + $0x84] ss:$8 sps:$4 sm:$0xff]  }
 0x1b7   : > { %v2354_v52 = vld [vmem:[#allocation9 + $0x184] ss:$8 sps:$4 sm:$0xff]   ;;  %v2349_v53 = vld [vmem:[#allocation9 + $0x80] ss:$8 sps:$4 sm:$0xff]   ;;  %vm1069_vm5 = vcmp.lt.s32.totalorder %v354_v4, 256 }
 0x1b8   : > { %v2352_v54 = vld [vmem:[#allocation9 + $0x180] ss:$8 sps:$4 sm:$0xff]  }
 0x1b9   : > { %972 = vmatpush1.bf16.msra.mxu0 %v2271_v58  ;;  %1013 = vmatpush1.bf16.msra.mxu1 %v2274_v59  ;;  %v425_v55 = vld [vmem:[#allocation13] sm:$0xf] }
 0x1ba   : > { %973 = vmatprep.subr.bf16.mxu0 %v2279_v60  ;;  %1014 = vmatprep.subr.bf16.mxu1 %v2282_v61  ;;  %v460_v56 = vrot.slane %v425_v55, %v2942_v13  ;;  %v452_v57 = vrot.slane %v425_v55, %v2936_v11  ;;  %v456_v58 = vrot.slane %v425_v55, %v2939_v12 }
 0x1bb   : > { %v464_v59 = vrot.slane %v425_v55, %v368_v14  ;;  %v426_v14 = vld [vmem:[#allocation13 + $0x4] sm:$0x3] }
 0x1bd   : > { %974 = vmatpush1.bf16.msra.mxu0 %v2277_v62  ;;  %1015 = vmatpush1.bf16.msra.mxu1 %v2280_v63 }
 0x1be   : > { %975 = vmatprep.subr.bf16.mxu0 %v2285_v0  ;;  %1016 = vmatprep.subr.bf16.mxu1 %v2288_v1 }
 0x1c1   : > { %976 = vmatpush1.bf16.msra.mxu0 %v2283_v2  ;;  %1017 = vmatpush1.bf16.msra.mxu1 %v2286_v3 }
 0x1c2   : > { %977 = vmatprep.subr.bf16.mxu0 %v2291_v6  ;;  %1018 = vmatprep.subr.bf16.mxu1 %v2294_v7 }
 0x1c5   : > { %978 = vmatpush1.bf16.msra.mxu0 %v2289_v8  ;;  %1019 = vmatpush1.bf16.msra.mxu1 %v2292_v9 }
 0x1c6   : > { %979 = vmatprep.subr.bf16.mxu0 %v2297_v10  ;;  %1020 = vmatprep.subr.bf16.mxu1 %v2300_v15 }
 0x1c9   : > { %980 = vmatpush1.bf16.msra.mxu0 %v2295_v17  ;;  %1021 = vmatpush1.bf16.msra.mxu1 %v2298_v18 }
 0x1ca   : > { %981 = vmatprep.subr.bf16.mxu0 %v2303_v19  ;;  %1022 = vmatprep.subr.bf16.mxu1 %v2306_v20  ;;  %v960_v19 = vrot.slane %v426_v14, %v2936_v11  ;;  %v964_v20 = vrot.slane %v426_v14, %v2939_v12 }
 0x1cd   : > { %982 = vmatpush1.bf16.msra.mxu0 %v2301_v21  ;;  %1023 = vmatpush1.bf16.msra.mxu1 %v2304_v22 }
 0x1ce   : > { %983 = vmatprep.subr.bf16.mxu0 %v2309_v23  ;;  %1024 = vmatprep.subr.bf16.mxu1 %v2312_v24 }
 0x1d1   : > { %984 = vmatpush2.bf16.msra.mxu0 %v2307_v25  ;;  %1025 = vmatpush2.bf16.msra.mxu1 %v2310_v26 }
 0x1d2   : > { %985 = vmatprep.subr.bf16.mxu0 %v2315_v27  ;;  %1026 = vmatprep.subr.bf16.mxu1 %v2318_v28 }
 0x1d5   : > { %986 = vmatpush2.bf16.msra.mxu0 %v2313_v29  ;;  %1027 = vmatpush2.bf16.msra.mxu1 %v2316_v30 }
 0x1d6   : > { %987 = vmatprep.subr.bf16.mxu0 %v2321_v31  ;;  %1028 = vmatprep.subr.bf16.mxu1 %v2324_v32 }
 0x1d9   : > { %988 = vmatpush2.bf16.msra.mxu0 %v2319_v33  ;;  %1029 = vmatpush2.bf16.msra.mxu1 %v2322_v34 }
 0x1da   : > { %989 = vmatprep.subr.bf16.mxu0 %v2327_v35  ;;  %1030 = vmatprep.subr.bf16.mxu1 %v2330_v36 }
 0x1dd   : > { %990 = vmatpush2.bf16.msra.mxu0 %v2325_v37  ;;  %1031 = vmatpush2.bf16.msra.mxu1 %v2328_v38 }
 0x1de   : > { %991 = vmatprep.subr.bf16.mxu0 %v2333_v39  ;;  %1032 = vmatprep.subr.bf16.mxu1 %v2336_v40 }
 0x1e1   : > { %992 = vmatpush2.bf16.msra.mxu0 %v2331_v41  ;;  %1033 = vmatpush2.bf16.msra.mxu1 %v2334_v42 }
 0x1e2   : > { %993 = vmatprep.subr.bf16.mxu0 %v2339_v43  ;;  %1034 = vmatprep.subr.bf16.mxu1 %v2342_v44 }
 0x1e5   : > { %994 = vmatpush2.bf16.msra.mxu0 %v2337_v45  ;;  %1035 = vmatpush2.bf16.msra.mxu1 %v2340_v46 }
 0x1e6   : > { %995 = vmatprep.subr.bf16.mxu0 %v2345_v47  ;;  %1036 = vmatprep.subr.bf16.mxu1 %v2348_v48 }
 0x1e9   : > { %996 = vmatpush2.bf16.msra.mxu0 %v2343_v49  ;;  %1037 = vmatpush2.bf16.msra.mxu1 %v2346_v50 }
 0x1ea   : > { %997 = vmatprep.subr.bf16.mxu0 %v2351_v51  ;;  %1038 = vmatprep.subr.bf16.mxu1 %v2354_v52 }
 0x1ed   : > { %998 = vmatpush2.bf16.msra.mxu0 %v2349_v53  ;;  %1039 = vmatpush2.bf16.msra.mxu1 %v2352_v54 }
 0x270   : > { %v520_v60 = vpop.f32.mrf.mxu0  ;;  %v561_v61 = vpop.f32.mrf.mxu1 }
 0x271   : > { %v562_v62 = vadd.f32 %v561_v61, %v460_v56  ;;  %v521_v63 = vadd.f32 %v520_v60, %v452_v57 }
 0x272   : > { %v522_v0 = vpop.f32.mrf.mxu0  ;;  %v563_v1 = vpop.f32.mrf.mxu1 }
 0x273   : > { %v523_v2 = vadd.f32 %v522_v0, %v456_v58  ;;  %v564_v3 = vadd.f32 %v563_v1, %v464_v59  ;;  %v570_v6 = vpack.c.bf16 %v562_v62, %v562_v62  ;;  %v568_v15 = vpack.c.bf16 %v521_v63, %v521_v63 }
 0x274   : > { %v524_v7 = vpop.f32.mrf.mxu0  ;;  %v565_v8 = vpop.f32.mrf.mxu1 }
 0x275   : > { %v569_v9 = vpack.c.bf16 %v523_v2, %v523_v2  ;;  %v571_v10 = vpack.c.bf16 %v564_v3, %v564_v3 }
 0x276   : > { %v525_v17 = vpop.f32.mrf.mxu0  ;;  %v566_v18 = vpop.f32.mrf.mxu1 }
 0x277   : > { %999 = vmatprep.mubr.bf16.mxu0 %v569_v9  ;;  %1040 = vmatprep.mubr.bf16.mxu1 %v571_v10 }
 0x278   : > { %1000 = vmatmul.mubr.bf16.vlgmr.msra.gmra.mxu0 %v568_v15  ;;  %1041 = vmatmul.mubr.bf16.vlgmr.msra.gmra.mxu1 %v570_v6 }
 0x338   : > { %v1001_v21 = vpop.f32.mrf.mxu0  ;;  %v1042_v22 = vpop.f32.mrf.mxu1 }
 0x339   : > { %v1002_v23 = vadd.f32 %v1001_v21, %v960_v19 }
 0x33a   : > { %v1003_v24 = vpop.f32.mrf.mxu0  ;;  %v1044_v25 = vpop.f32.mrf.mxu1 }
 0x33b   : > { %v1004_v26 = vadd.f32 %v1003_v24, %v964_v20  ;;  %v1043_v29 = vadd.f32 %v1042_v22, %v1002_v23 }
 0x33c   : > { %v1005_v27 = vpop.f32.mrf.mxu0  ;;  %v1046_v28 = vpop.f32.mrf.mxu1 }
 0x33d   : > { %v1045_v30 = vadd.f32 %v1044_v25, %v1004_v26 }
 0x33e   : > { %v1006_v31 = vpop.f32.mrf.mxu0  ;;  %v1047_v32 = vpop.f32.mrf.mxu1 }
 0x33f   : > { %v1051_v33 = vcombine.low %v1043_v29, %v1045_v30 }
 0x341   : > { %v1058_v34 = vrot.slane %v1051_v33, %v2946_v16 }
 0x343   : > { %v1065_v35 = vrot.slane %v1058_v34, %v2946_v16 }
 0x345   : > { %1079 = vst.msk [vmem:[%s1078_s17] ss:$2 sm:$0x3] %vm1069_vm5, %v1065_v35 }
 0x346 PF: > { %p1080_p3 = scmp.eq.s32.totalorder %s2691_s25, 1 }
 0x348   : > { %p1081_p0 = pnand %p1080_p3, %p421_p12 }
 0x34a   : > { %1084 = sbr.rel (%p1081_p0) target bundleno = 1337 (0x539), region = 80 }
 0x34f   : > { %v2355_v36 = vld [vmem:[#allocation10 + $0xac] ss:$12 sps:$4 sm:$0xff]   ;;  %v2357_v37 = vld [vmem:[#allocation10 + $0xa8] ss:$12 sps:$4 sm:$0xff]   ;;  %v2360_v39 = vld [vmem:[#allocation10 + $0x90] ss:$12 sps:$4 sm:$0xff]  }
 0x350   : > { %1524 = vmatprep.subr.bf16.mxu0 %v2355_v36  ;;  %v2358_v38 = vld [vmem:[#allocation10 + $0x94] ss:$12 sps:$4 sm:$0xff]   ;;  %v2361_v40 = vld [vmem:[#allocation10 + $0x7c] ss:$12 sps:$4 sm:$0xff]   ;;  %v2363_v4 = vld [vmem:[#allocation10 + $0x78] ss:$12 sps:$4 sm:$0xff]  }
 0x351   : > { %1525 = vmatpush1.bf16.msra.mxu0 %v2357_v37  ;;  %v2364_v16 = vld [vmem:[#allocation10 + $0x64] ss:$12 sps:$4 sm:$0xff]   ;;  %v2722_v41 = vmov 1983009808   ;;  %v2366_v43 = vld [vmem:[#allocation10 + $0x60] ss:$12 sps:$4 sm:$0xff]  }
 0x352   : > { %1526 = vmatprep.subr.bf16.mxu0 %v2358_v38  ;;  %v1088_v42 = vunpack.c.l.s4 %v2722_v41  ;;  %v2367_v44 = vld [vmem:[#allocation10 + $0x4c] ss:$12 sps:$4 sm:$0xff]   ;;  %v2369_v46 = vld [vmem:[#allocation10 + $0x48] ss:$12 sps:$4 sm:$0xff]   ;;  %v2372_v49 = vld [vmem:[#allocation10 + $0x30] ss:$12 sps:$4 sm:$0xff]  }
 0x353   : > { %v2370_v47 = vld [vmem:[#allocation10 + $0x34] ss:$12 sps:$4 sm:$0xff]   ;;  %v2373_v50 = vld [vmem:[#allocation10 + $0x1c] ss:$12 sps:$4 sm:$0xff]   ;;  %vm1097_vm6 = vcmask 1041408  }
 0x354   : > { %v1089_v45 = vunpack.c.0.s8 %v1088_v42  ;;  %v2375_v51 = vld [vmem:[#allocation10 + $0x18] ss:$12 sps:$4 sm:$0xff]   ;;  %v2979_v52 = vld [vmem:[#allocation3] sm:$0xf]  ;;  %v2403_v55 = vld [vmem:[#allocation10 + $0x170] ss:$12 sps:$4 sm:$0xff]  }
 0x355   : > { %1527 = vmatpush1.bf16.msra.mxu0 %v2360_v39  ;;  %v2376_v53 = vld [vmem:[#allocation10 + $0x4] ss:$12 sps:$4 sm:$0xff]   ;;  %2072 = vmatprep.subr.bf16.mxu1 %v2403_v55  ;;  %v2378_v59 = vld [vmem:[#allocation10] ss:$12 sps:$4 sm:$0xff]   ;;  %v2409_v8 = vld [vmem:[#allocation10 + $0x128] ss:$12 sps:$4 sm:$0xff]  }
 0x356   : > { %1528 = vmatprep.subr.bf16.mxu0 %v2361_v40  ;;  %v2977_v48 = vsub.s32 %v1089_v45, %v2931_v5  ;;  %v2404_v56 = vld [vmem:[#allocation10 + $0xb0] ss:$12 sps:$4 sm:$0xff]   ;;  %v2405_v58 = vld [vmem:[#allocation10 + $0x158] ss:$12 sps:$4 sm:$0xff]   ;;  %v2407_v2 = vld [vmem:[#allocation10 + $0x140] ss:$12 sps:$4 sm:$0xff]  }
 0x357   : > { %2073 = vmatpush3.bf16.msra.mxu1 %v2404_v56  ;;  %v2379_v61 = vld [vmem:[#allocation10 + $0x16c] ss:$12 sps:$4 sm:$0xff]   ;;  %v2381_v9 = vld [vmem:[#allocation10 + $0x168] ss:$12 sps:$4 sm:$0xff]   ;;  %v2384_v18 = vld [vmem:[#allocation10 + $0x150] ss:$12 sps:$4 sm:$0xff]  }
 0x358   : > { %v1093_v54 = vrot.slane %v2979_v52, %v2977_v48  ;;  %2074 = vmatprep.subr.bf16.mxu1 %v2405_v58  ;;  %v2406_v63 = vld [vmem:[#allocation10 + $0x98] ss:$12 sps:$4 sm:$0xff]   ;;  %v2408_v3 = vld [vmem:[#allocation10 + $0x80] ss:$12 sps:$4 sm:$0xff]   ;;  %v2410_v20 = vld [vmem:[#allocation10 + $0x68] ss:$12 sps:$4 sm:$0xff]  }
 0x359   : > { %1529 = vmatpush1.bf16.msra.mxu0 %v2363_v4  ;;  %v2382_v17 = vld [vmem:[#allocation10 + $0x154] ss:$12 sps:$4 sm:$0xff]   ;;  %v2411_v21 = vld [vmem:[#allocation10 + $0x110] ss:$12 sps:$4 sm:$0xff]   ;;  %v2387_v25 = vld [vmem:[#allocation10 + $0x138] ss:$12 sps:$4 sm:$0xff]  }
 0x35a   : > { %1530 = vmatprep.subr.bf16.mxu0 %v2364_v16  ;;  %v1094_v57 = vcombine.high %v1093_v54, %v1093_v54  ;;  %v1098_v5 = vsel %vm1097_vm6, %v1093_v54, 0.0  ;;  %v2385_v24 = vld [vmem:[#allocation10 + $0x13c] ss:$12 sps:$4 sm:$0xff]   ;;  %v2388_v29 = vld [vmem:[#allocation10 + $0x124] ss:$12 sps:$4 sm:$0xff]  }
 0x35b   : > { %v1099_v60 = vrot.slane %v1098_v5, 4  ;;  %2075 = vmatpush3.bf16.msra.mxu1 %v2406_v63  ;;  %v2412_v28 = vld [vmem:[#allocation10 + $0x50] ss:$12 sps:$4 sm:$0xff]   ;;  %v2413_v30 = vld [vmem:[#allocation10 + $0xf8] ss:$12 sps:$4 sm:$0xff]  }
 0x35c   : > { %v1105_v62 = vsel %vm1097_vm6, %v1094_v57, 0.0  ;;  %2076 = vmatprep.subr.bf16.mxu1 %v2407_v2  ;;  %v2414_v32 = vld [vmem:[#allocation10 + $0x38] ss:$12 sps:$4 sm:$0xff]   ;;  %v2415_v33 = vld [vmem:[#allocation10 + $0xe0] ss:$12 sps:$4 sm:$0xff]  }
 0x35d   : > { %1531 = vmatpush1.bf16.msra.mxu0 %v2366_v43  ;;  %v1100_v0 = vadd.f32 %v1099_v60, %v1098_v5  ;;  %v1106_v1 = vrot.slane %v1105_v62, 4  ;;  %v2390_v34 = vld [vmem:[#allocation10 + $0x120] ss:$12 sps:$4 sm:$0xff]   ;;  %v2417_v39 = vld [vmem:[#allocation10 + $0xc8] ss:$12 sps:$4 sm:$0xff]   ;;  %v2419_v43 = vld [vmem:[#allocation12 + $0x78] sm:$0xff]  }
 0x35e   : > { %1532 = vmatprep.subr.bf16.mxu0 %v2367_v44  ;;  %v2391_v36 = vld [vmem:[#allocation10 + $0x10c] ss:$12 sps:$4 sm:$0xff]   ;;  %v2393_v40 = vld [vmem:[#allocation10 + $0x108] ss:$12 sps:$4 sm:$0xff]   ;;  %v2396_v44 = vld [vmem:[#allocation10 + $0xf0] ss:$12 sps:$4 sm:$0xff]  }
 0x35f   : > { %v1101_v6 = vrot.slane %v1100_v0, 2  ;;  %v1107_v7 = vadd.f32 %v1106_v1, %v1105_v62  ;;  %2077 = vmatpush3.bf16.msra.mxu1 %v2408_v3  ;;  %v2416_v38 = vld [vmem:[#allocation10 + $0x20] ss:$12 sps:$4 sm:$0xff]   ;;  %v2418_v42 = vld [vmem:[#allocation10 + $0x8] ss:$12 sps:$4 sm:$0xff]  }
 0x360   : > { %2078 = vmatprep.subr.bf16.mxu1 %v2409_v8  ;;  %v2394_v16 = vld [vmem:[#allocation10 + $0xf4] ss:$12 sps:$4 sm:$0xff]   ;;  %v2399_v54 = vld [vmem:[#allocation10 + $0xd8] ss:$12 sps:$4 sm:$0xff]  }
 0x361   : > { %1533 = vmatpush1.bf16.msra.mxu0 %v2369_v46  ;;  %v1102_v10 = vadd.f32 %v1101_v6, %v1100_v0  ;;  %v1108_v15 = vrot.slane %v1107_v7, 2  ;;  %v2397_v46 = vld [vmem:[#allocation10 + $0xdc] ss:$12 sps:$4 sm:$0xff]   ;;  %v2400_v55 = vld [vmem:[#allocation10 + $0xc4] ss:$12 sps:$4 sm:$0xff]  }
 0x362   : > { %1534 = vmatprep.subr.bf16.mxu0 %v2370_v47 }
 0x363   : > { %v1103_v14 = vrot.slane %v1102_v10, 1  ;;  %v1109_v19 = vadd.f32 %v1108_v15, %v1107_v7  ;;  %2079 = vmatpush3.bf16.msra.mxu1 %v2410_v20 }
 0x364   : > { %2080 = vmatprep.subr.bf16.mxu1 %v2411_v21 }
 0x365   : > { %1535 = vmatpush1.bf16.msra.mxu0 %v2372_v49  ;;  %v1104_v22 = vadd.f32 %v1103_v14, %v1102_v10  ;;  %v1110_v23 = vrot.slane %v1109_v19, 1 }
 0x366   : > { %1536 = vmatprep.subr.bf16.mxu0 %v2373_v50 }
 0x367   : > { %v1111_v26 = vadd.f32 %v1110_v23, %v1109_v19  ;;  %v1113_v27 = vmul.f32 0.5, %v1104_v22  ;;  %2081 = vmatpush3.bf16.msra.mxu1 %v2412_v28  ;;  %v2420_v22 = vld [vmem:[#allocation12 + $0x38] sm:$0xff]   ;;  %v2421_v23 = vld [vmem:[#allocation12 + $0x70] sm:$0xff]   ;;  %v2426_v28 = vld [vmem:[#allocation12 + $0x20] sm:$0xff]  }
 0x368   : > { %2082 = vmatprep.subr.bf16.mxu1 %v2413_v30  ;;  %v2429_v30 = vld [vmem:[#allocation12 + $0x50] sm:$0xff]  }
 0x369   : > { %1537 = vmatpush1.bf16.msra.mxu0 %v2375_v51  ;;  %v1114_v31 = vmul.f32 0.5, %v1111_v26  ;;  %v2424_v26 = vld [vmem:[#allocation12 + $0x28] sm:$0xff]  }
 0x36a   : > { %1538 = vmatprep.subr.bf16.mxu0 %v2376_v53 }
 0x36b   : > { %v1117_v35 = vcombine.low %v1113_v27, %v1114_v31  ;;  %2083 = vmatpush3.bf16.msra.mxu1 %v2414_v32  ;;  %v2425_v27 = vld [vmem:[#allocation12 + $0x60] sm:$0xff]   ;;  %v2430_v31 = vld [vmem:[#allocation12 + $0x10] sm:$0xff]   ;;  %v2431_v32 = vld [vmem:[#allocation12 + $0x48] sm:$0xff]  }
 0x36c   : > { %2084 = vmatprep.subr.bf16.mxu1 %v2415_v33  ;;  %v2432_v33 = vld [vmem:[#allocation12 + $0x8] sm:$0xff]  }
 0x36d   : > { %1539 = vmatpush1.bf16.msra.mxu0 %v2378_v59  ;;  %v1124_v37 = vrot.slane %v1117_v35, %v2977_v48  ;;  %v2402_v59 = vld [vmem:[#allocation10 + $0xc0] ss:$12 sps:$4 sm:$0xff]  }
 0x36e   : > { %1540 = vmatprep.subr.bf16.mxu0 %v2379_v61  ;;  %v2434_v35 = vld [vmem:[#allocation12] sm:$0xff]  }
 0x36f   : > { %v1126_v4 = vsub.f32 %v2979_v52, %v1124_v37  ;;  %2085 = vmatpush3.bf16.msra.mxu1 %v2416_v38 }
 0x370   : > { %2086 = vmatprep.subr.bf16.mxu1 %v2417_v39 }
 0x371   : > { %1541 = vmatpush2.bf16.msra.mxu0 %v2381_v9  ;;  %v1127_v41 = vmul.f32 %v1126_v4, %v1126_v4 }
 0x372   : > { %1542 = vmatprep.subr.bf16.mxu0 %v2382_v17 }
 0x373   : > { %v1135_v45 = vrot.slane %v1127_v41, %v2977_v48  ;;  %2087 = vmatpush3.bf16.msra.mxu1 %v2418_v42 }
 0x374   : > { %2094 = vmatprep.subr.bf16.mxu1 %v2419_v43 }
 0x375   : > { %1543 = vmatpush2.bf16.msra.mxu0 %v2384_v18  ;;  %v1136_v47 = vcombine.high %v1135_v45, %v1135_v45  ;;  %v1139_v49 = vsel %vm1097_vm6, %v1135_v45, 0.0 }
 0x376   : > { %1544 = vmatprep.subr.bf16.mxu0 %v2385_v24  ;;  %v1140_v50 = vrot.slane %v1139_v49, 4  ;;  %v2422_v24 = vld [vmem:[#allocation12 + $0x30] sm:$0xff]  }
 0x377   : > { %v1146_v51 = vsel %vm1097_vm6, %v1136_v47, 0.0 }
 0x378   : > { %v1141_v52 = vadd.f32 %v1140_v50, %v1139_v49  ;;  %v1147_v53 = vrot.slane %v1146_v51, 4 }
 0x379   : > { %1545 = vmatpush2.bf16.msra.mxu0 %v2387_v25  ;;  %v2423_v25 = vld [vmem:[#allocation12 + $0x68] sm:$0xff]  }
 0x37a   : > { %1546 = vmatprep.subr.bf16.mxu0 %v2388_v29  ;;  %v1142_v56 = vrot.slane %v1141_v52, 2  ;;  %v1148_v57 = vadd.f32 %v1147_v53, %v1146_v51  ;;  %v2428_v29 = vld [vmem:[#allocation12 + $0x18] sm:$0xff]  }
 0x37c   : > { %v1143_v5 = vadd.f32 %v1142_v56, %v1141_v52  ;;  %v1149_v58 = vrot.slane %v1148_v57, 2 }
 0x37d   : > { %1547 = vmatpush2.bf16.msra.mxu0 %v2390_v34  ;;  %v2433_v34 = vld [vmem:[#allocation12 + $0x40] sm:$0xff]  }
 0x37e   : > { %1548 = vmatprep.subr.bf16.mxu0 %v2391_v36  ;;  %v1144_v60 = vrot.slane %v1143_v5, 1  ;;  %v1150_v61 = vadd.f32 %v1149_v58, %v1148_v57  ;;  %v1174_v36 = vld [vmem:[#allocation13 + $0x6] sm:$0x7] }
 0x37f   : > { %v1256_v37 = vrot.slane %v1174_v36, %v2936_v11  ;;  %v1260_v38 = vrot.slane %v1174_v36, %v2939_v12 }
 0x380   : > { %v1145_v62 = vadd.f32 %v1144_v60, %v1143_v5  ;;  %v1151_v63 = vrot.slane %v1150_v61, 1 }
 0x381   : > { %1549 = vmatpush2.bf16.msra.mxu0 %v2393_v40 }
 0x382   : > { %1550 = vmatprep.subr.bf16.mxu0 %v2394_v16  ;;  %v1152_v0 = vadd.f32 %v1151_v63, %v1150_v61  ;;  %v1153_v1 = vmul.f32 0.5, %v1145_v62  ;;  %v1264_v16 = vrot.slane %v1174_v36, %v2942_v13 }
 0x384   : > { %v1154_v2 = vmul.f32 0.5, %v1152_v0  ;;  %v1155_v3 = vadd.f32 1e-05, %v1153_v1 }
 0x385   : > { %1551 = vmatpush2.bf16.msra.mxu0 %v2396_v44 }
 0x386   : > { %1552 = vmatprep.subr.bf16.mxu0 %v2397_v46  ;;  %v1156_v6 = vadd.f32 1e-05, %v1154_v2  ;;  %2435 = vrsqrt.f32 %v1155_v3 }
 0x388   : > { %2437 = vrsqrt.f32 %v1156_v6 }
 0x389   : > { %1553 = vmatpush2.bf16.msra.mxu0 %v2399_v54 }
 0x38a   : > { %1554 = vmatprep.subr.bf16.mxu0 %v2400_v55  ;;  %v2050_v55 = vld [vmem:[#allocation13 + $0x9] ss:$0 sm:$0xff] }
 0x38d   : > { %1555 = vmatpush2.bf16.msra.mxu0 %v2402_v59 }
 0x393   : > { %v2436_v7 = vpop.eup %2435 }
 0x395   : > { %v2438_v8 = vpop.eup %2437 }
 0x396   : > { %v1161_v9 = vcombine.low %v2436_v7, %v2438_v8 }
 0x398   : > { %v1168_v10 = vrot.slane %v1161_v9, %v2977_v48 }
 0x39a   : > { %v1170_v15 = vmul.f32 %v1168_v10, %v1126_v4 }
 0x39c   : > { %vm1171_vm7 = vcmp.ge.f32.partialorder %v1170_v15, 0.0  ;;  %v1172_v17 = vmul.f32 0.01, %v1170_v15 }
 0x39e   : > { %v1173_v18 = vsel %vm1171_vm7, %v1170_v15, %v1172_v17 }
 0x39f   : > { %v1182_v14 = vrot.slane %v1173_v18, %v2977_v48  ;;  %v2427_v48 = vld [vmem:[#allocation12 + $0x58] sm:$0xff]  }
 0x3a1   : > { %v1183_v19 = vcombine.high %v1182_v14, %v1182_v14  ;;  %v1186_v20 = vpack.c.bf16 %v1182_v14, %v1182_v14 }
 0x3a3   : > { %v1187_v21 = vpack.c.bf16 %v1183_v19, %v1183_v19 }
 0x3a5   : > { %1556 = vmatprep.mubr.bf16.mxu0 %v1187_v21  ;;  %1597 = vmatprep.mubr.bf16.mxu1 %v1187_v21 }
 0x3a6   : > { %1557 = vmatmul.mubr.bf16.vlgmr.msra.gmra.mxu0 %v1186_v20  ;;  %1598 = vmatmul.mubr.bf16.vlgmr.msra.gmra.mxu1 %v1186_v20 }
 0x3a7   : > { %2095 = vmatpush3.bf16.msra.mxu1 %v2420_v22 }
 0x3a8   : > { %2096 = vmatprep.subr.bf16.mxu1 %v2421_v23 }
 0x3ab   : > { %2097 = vmatpush3.bf16.msra.mxu1 %v2422_v24 }
 0x3ac   : > { %2098 = vmatprep.subr.bf16.mxu1 %v2423_v25 }
 0x3af   : > { %2099 = vmatpush3.bf16.msra.mxu1 %v2424_v26 }
 0x3b0   : > { %2100 = vmatprep.subr.bf16.mxu1 %v2425_v27 }
 0x3b3   : > { %2101 = vmatpush3.bf16.msra.mxu1 %v2426_v28 }
 0x3b4   : > { %2102 = vmatprep.subr.bf16.mxu1 %v2427_v48 }
 0x3b7   : > { %2103 = vmatpush3.bf16.msra.mxu1 %v2428_v29 }
 0x3b8   : > { %2104 = vmatprep.subr.bf16.mxu1 %v2429_v30 }
 0x3bb   : > { %2105 = vmatpush3.bf16.msra.mxu1 %v2430_v31 }
 0x3bc   : > { %2106 = vmatprep.subr.bf16.mxu1 %v2431_v32 }
 0x3bf   : > { %2107 = vmatpush3.bf16.msra.mxu1 %v2432_v33 }
 0x3c0   : > { %2108 = vmatprep.subr.bf16.mxu1 %v2433_v34 }
 0x3c3   : > { %2109 = vmatpush3.bf16.msra.mxu1 %v2434_v35 }
 0x466   : > { %v1558_v39 = vpop.f32.mrf.mxu0  ;;  %v2088_v40 = vpop.f32.mrf.mxu1 }
 0x467   : > { %v1559_v4 = vadd.f32 %v1558_v39, %v1256_v37 }
 0x468   : > { %v1560_v41 = vpop.f32.mrf.mxu0  ;;  %v2089_v42 = vpop.f32.mrf.mxu1 }
 0x469   : > { %vm1605_vm8 = vcmp.ge.f32.partialorder %v1559_v4, 0.0  ;;  %v1607_v43 = vmul.f32 0.01, %v1559_v4  ;;  %v1561_v44 = vadd.f32 %v1560_v41, %v1260_v38  ;;  %v2090_v45 = vadd.f32 %v2089_v42, %v2088_v40 }
 0x46a   : > { %v1562_v46 = vpop.f32.mrf.mxu0  ;;  %v2091_v47 = vpop.f32.mrf.mxu1 }
 0x46b   : > { %vm1606_vm9 = vcmp.ge.f32.partialorder %v1561_v44, 0.0  ;;  %v1608_v49 = vmul.f32 0.01, %v1561_v44  ;;  %v1600_v50 = vadd.f32 %v2090_v45, %v1264_v16  ;;  %v1609_v51 = vsel %vm1605_vm8, %v1559_v4, %v1607_v43 }
 0x46c   : > { %v1563_v11 = vpop.f32.mrf.mxu0  ;;  %v2092_v52 = vpop.f32.mrf.mxu1  ;;  %v1613_v54 = vpack.c.bf16 %v1609_v51, %v1609_v51 }
 0x46d   : > { %v1610_v12 = vsel %vm1606_vm9, %v1561_v44, %v1608_v49  ;;  %1611 = vst [vmem:[#allocation15] sm:$0x3] %v1600_v50 }
 0x46e   : > { %v1614_v53 = vpack.c.bf16 %v1610_v12, %v1610_v12 }
 0x470   : > { %1781 = vmatprep.mubr.bf16.mxu1 %v1614_v53 }
 0x471   : > { %1782 = vmatmul.mubr.bf16.vlgmr.msra.gmra.mxu1 %v1613_v54 }
 0x531   : > { %v2110_v13 = vpop.f32.mrf.mxu1 }
 0x533   : > { %v2111_v56 = vpop.f32.mrf.mxu1 }
 0x534   : > { %v2112_v57 = vadd.f32 %v2111_v56, %v2110_v13 }
 0x535   : > { %v2113_v5 = vpop.f32.mrf.mxu1 }
 0x536   : > { %v1784_v58 = vadd.f32 %v2112_v57, %v2050_v55 }
 0x537   : > { %v2114_v59 = vpop.f32.mrf.mxu1 }
 0x538   : > { %1789 = vst [vmem:[#allocation15 + $0x2] sm:$0x3] %v1784_v58 }
 0x539 PF: > { %s3065_s24 = sadd.s32 4294967295, %s2703_s28   ;;  %s2723_s21 = smov [#allocation15]  }
 0x53a   : > { %p2997_p1 = scmp.eq.s32.totalorder %s3065_s24, 3  ;;  %s1797_s18 = sshll.u32 %s2723_s21, 4  ;;  %s1798_s18 = int_to_ptr.vmem [resolvable:$true] %s1797_s18 }
 0x53b   : > { %s2597_s19 = scalar_lea.vmem %s1798_s18, 64  ;;  %p2604_p7 = scmp.lt.s32.totalorder %s1798_s18, %s1798_s18 }
 0x53c   : > { %p2598_p2 = scmp.ne.s32.totalorder %s1798_s18, %s2597_s19  ;;  %p2605_p8 = scmp.lt.s32.totalorder %s2597_s19, %s2597_s19 }
 0x53e   : > { %p2599_p6 = pnand %p2598_p2, %p2997_p1  ;;  %p2606_p9 = por %p2605_p8, %p2604_p7 }
 0x540   : > { %p2600_p4 = pneg %p2599_p6 }
 0x542   : > { %p2607_p10 = pnand %p2606_p9, %p2600_p4 }
 0x544   : > { %2610 = shalt.err (!%p2607_p10)
}
 0x545   : > { %2139 = dma.vmem_to_hbm [thread:$0]  (%p2997_p1), %s1798_s18, 64, %s3042_s6, [#allocation6]  }
 0x546   : > { %2670 = dma.done.wait (%p2997_p1), [#allocation6], 64  }
 0x547   : > { %2672 = vsyncadd (%p2997_p1), [#allocation6], 4294967232 }
 0x548 PF: > { %s23_s28 = sadd.s32 1, %s2703_s28   ;;  %s3067_s21 = smov %s2679_s22 }
 0x549   : > { %p20_p5 = scmp.ge.s32.totalorder %s23_s28, 6   ;;  %s3068_s22 = smov %s2683_s23 }
 0x54a   : > { %s3069_s23 = smov %s2892_s11  ;;  %s3070_s24 = smov %s2695_s26 }
 0x54b   : > { %s3071_s25 = smov %s2699_s27  ;;  %s3072_s26 = smov %s3075_s15 }
 0x54c   : > { %s3073_s27 = smov %s3079_s12  ;;  %22 = sbr.rel (!%p20_p5) target bundleno = 14 (0xe), region = 114 }
 0x551   :  { %1810 = vsyncpa [#allocation5], 1 }
 0x552   :  { %1812 = vsyncpa [#allocation5 + $0x1], 1 }
 0x553   :  { %1813 = vsyncpa [#allocation8], 1 }
 0x554   :  { %1814 = vsyncpa [#allocation11], 1 }
 0x555   :  { %1815 = vsyncpa [#allocation14], 1 }
 0x556   :  { %1816 = vsyncpa [#allocation6], 1 }
 0x557   :  { %1818 = vsyncpa [#allocation6 + $0x1], 1 }

</bundles_post_ra>
